<compile_context>
chip_gen: v6e
topology: v6e:2x2x1
jax: 0.10.0
libtpu: 0.0.40
codegen_flags: <defaults>
</compile_context>

<pallas_src>
import jax
import jax.numpy as jnp
from jax.experimental import pallas as pl
from jax.experimental.pallas import tpu as pltpu


def policy_kernel(x_ref, w1_ref, b1_ref, w2_ref, b2_ref, o_ref):
    # One batch tile per grid step; weights/biases are the same block every step.
    h = jnp.dot(x_ref[...], w1_ref[...],
                preferred_element_type=jnp.float32)        # (TB, H)  bf16 MXU, f32 acc
    h = h + b1_ref[...]                                    # broadcast (1, H), f32
    # dropout(p=0.6) in eval mode == identity
    h = jnp.maximum(h, 0.0)                                # ReLU (VPU, f32)
    y = jnp.dot(h.astype(jnp.bfloat16), w2_ref[...],
                preferred_element_type=jnp.float32)        # (TB, D_out) MXU, f32 acc
    y = y + b2_ref[...]                                    # broadcast (1, D_out)
    o_ref[...] = jax.nn.sigmoid(y)                         # f32 out (no redundant cast)


def _round_up(x, m):
    return (x + m - 1) // m * m


def _choose_tile_b(batch, d_in, d_out):
    """Large batch tile, capped so double-buffered tiles stay far below v7x's 64 MiB VMEM."""
    bytes_per_row = d_in * 2 + d_out * 4          # bf16 x row + f32 out row
    cap = max(8, (4 * 1024 * 1024) // max(bytes_per_row, 1))  # ~4 MiB per tile budget
    cap = max(8, (cap // 8) * 8)
    tile = min(2048, cap, _round_up(batch, 8))
    return max(8, tile)


def policy_forward(x, w1, b1, w2, b2):
    """x: (B, D_in) f32; w1: (D_in, H); b1: (1, H); w2: (H, D_out); b2: (1, D_out)."""
    B, D_in = x.shape
    H = w1.shape[1]
    D_out = w2.shape[1]

    # bf16 MXU inputs (f32 accumulate inside the kernel), f32 biases/output.
    x_bf = x.astype(jnp.bfloat16)
    w1_bf = w1.astype(jnp.bfloat16)
    w2_bf = w2.astype(jnp.bfloat16)
    b1_f = b1.astype(jnp.float32)
    b2_f = b2.astype(jnp.float32)

    tile_b = _choose_tile_b(B, D_in, D_out)
    B_pad = _round_up(B, tile_b)
    if B_pad != B:
        x_bf = jnp.pad(x_bf, ((0, B_pad - B), (0, 0)))
    grid = (B_pad // tile_b,)

    out = pl.pallas_call(
        policy_kernel,
        out_shape=jax.ShapeDtypeStruct((B_pad, D_out), jnp.float32),
        grid_spec=pltpu.PrefetchScalarGridSpec(
            num_scalar_prefetch=0,
            grid=grid,
            in_specs=[
                pl.BlockSpec((tile_b, D_in), lambda i: (i, 0)),   # x: tiled over batch
                pl.BlockSpec((D_in, H), lambda i: (0, 0)),        # w1: resident
                pl.BlockSpec((1, H), lambda i: (0, 0)),           # b1: resident
                pl.BlockSpec((H, D_out), lambda i: (0, 0)),       # w2: resident
                pl.BlockSpec((1, D_out), lambda i: (0, 0)),       # b2: resident
            ],
            out_specs=pl.BlockSpec((tile_b, D_out), lambda i: (i, 0)),
        ),
        compiler_params=pltpu.CompilerParams(
            dimension_semantics=("parallel",),  # megacore batch sharding on v7x
        ),
    )(x_bf, w1_bf, b1_f, w2_bf, b2_f)
    return out[:B]


# JIT the wrapper so the padding/casts fuse and weights are not re-staged per call.
policy_forward_jit = jax.jit(policy_forward)


def reference_forward(x, w1, b1, w2, b2):
    """Pure-JAX reference with the same bf16-input / f32-accumulate recipe."""
    h = jnp.dot(x.astype(jnp.bfloat16), w1.astype(jnp.bfloat16),
                preferred_element_type=jnp.float32) + b1
    h = jnp.maximum(h, 0.0)
    y = jnp.dot(h.astype(jnp.bfloat16), w2.astype(jnp.bfloat16),
                preferred_element_type=jnp.float32) + b2
    return jax.nn.sigmoid(y)


def init_params(key, input_dim, hidden_dim, output_dim):
    """Deterministic init mimicking torch.nn.Linear default (U[-1/sqrt(fan_in), +])."""
    k1, k2, k3, k4 = jax.random.split(key, 4)
    lim1 = 1.0 / (input_dim ** 0.5)
    lim2 = 1.0 / (hidden_dim ** 0.5)
    w1 = jax.random.uniform(k1, (input_dim, hidden_dim), jnp.float32, -lim1, lim1)
    b1 = jax.random.uniform(k2, (1, hidden_dim), jnp.float32, -lim1, lim1)
    w2 = jax.random.uniform(k3, (hidden_dim, output_dim), jnp.float32, -lim2, lim2)
    b2 = jax.random.uniform(k4, (1, output_dim), jnp.float32, -lim2, lim2)
    return w1, b1, w2, b2


if __name__ == "__main__":
    input_dim, hidden_dim, output_dim = 16, 32, 4

    key = jax.random.PRNGKey(0)
    kx, kp, kx2 = jax.random.split(key, 3)
    w1, b1, w2, b2 = init_params(kp, input_dim, hidden_dim, output_dim)

    # Small case matching the module's natural per-step usage (B=8).
    x_small = jax.random.normal(kx, (8, input_dim), jnp.float32)
    out_small = policy_forward_jit(x_small, w1, b1, w2, b2)
    jax.block_until_ready(out_small)
    ref_small = reference_forward(x_small, w1, b1, w2, b2)
    assert out_small.shape == (8, output_dim)
    assert jnp.allclose(out_small, ref_small, atol=2e-3, rtol=2e-3)
    # Sanity vs full-f32 math (bf16 input rounding only).
    ref_f32 = jax.nn.sigmoid(jnp.maximum(x_small @ w1 + b1, 0.0) @ w2 + b2)
    assert jnp.allclose(out_small, ref_f32, atol=3e-2, rtol=3e-2)

    # Larger batch to exercise the multi-step pipelined grid (non-divisible B on purpose).
    B_big = 4100
    x_big = jax.random.normal(kx2, (B_big, input_dim), jnp.float32)
    out_big = policy_forward_jit(x_big, w1, b1, w2, b2)
    jax.block_until_ready(out_big)
    ref_big = reference_forward(x_big, w1, b1, w2, b2)
    assert out_big.shape == (B_big, output_dim)
    assert jnp.allclose(out_big, ref_big, atol=2e-3, rtol=2e-3)

    print("KERNEL_OK")
</pallas_src>

<mosaic_0001>
module attributes {stable_mosaic.version = 11 : i64} {
  func.func @policy_kernel(%arg0: i32, %arg1: memref<8x16xbf16, #tpu.memory_space<vmem>>, %arg2: memref<16x32xbf16, #tpu.memory_space<vmem>>, %arg3: memref<1x32xf32, #tpu.memory_space<vmem>>, %arg4: memref<32x4xbf16, #tpu.memory_space<vmem>>, %arg5: memref<1x4xf32, #tpu.memory_space<vmem>>, %arg6: memref<8x4xf32, #tpu.memory_space<vmem>>) attributes {dimension_semantics = [#tpu.dimension_semantics<parallel>], iteration_bounds = array<i64: 1>, scalar_prefetch = 0 : i64, scratch_operands = 0 : i64, tpu.core_type = #tpu.core_type<tc>, window_params = [{transform_indices = @transform_0, window_bounds = array<i64: 8, 16>}, {pipeline_mode = #tpu.pipeline_mode<synchronous>, transform_indices = @transform_1, window_bounds = array<i64: 16, 32>}, {pipeline_mode = #tpu.pipeline_mode<synchronous>, transform_indices = @transform_2, window_bounds = array<i64: 1, 32>}, {pipeline_mode = #tpu.pipeline_mode<synchronous>, transform_indices = @transform_3, window_bounds = array<i64: 32, 4>}, {pipeline_mode = #tpu.pipeline_mode<synchronous>, transform_indices = @transform_4, window_bounds = array<i64: 1, 4>}, {transform_indices = @transform_5, window_bounds = array<i64: 8, 4>}]} {
    %c0 = arith.constant 0 : index
    %c0_0 = arith.constant 0 : index
    %0 = vector.load %arg1[%c0, %c0_0] : memref<8x16xbf16, #tpu.memory_space<vmem>>, vector<8x16xbf16>
    %c0_1 = arith.constant 0 : index
    %c0_2 = arith.constant 0 : index
    %1 = vector.load %arg2[%c0_1, %c0_2] : memref<16x32xbf16, #tpu.memory_space<vmem>>, vector<16x32xbf16>
    %cst = arith.constant dense<0.000000e+00> : vector<8x32xf32>
    %2 = tpu.matmul %0, %1, %cst {dimension_numbers = #tpu.dot_dimension_numbers<[1], [0], [0], [1], [0, 0, 1, 1], [], []>} : vector<8x16xbf16>, vector<16x32xbf16>, vector<8x32xf32> -> vector<8x32xf32>
    %c0_3 = arith.constant 0 : index
    %c0_4 = arith.constant 0 : index
    %3 = vector.load %arg3[%c0_3, %c0_4] : memref<1x32xf32, #tpu.memory_space<vmem>>, vector<1x32xf32>
    %4 = vector.broadcast %3 : vector<1x32xf32> to vector<8x32xf32>
    %5 = arith.addf %2, %4 : vector<8x32xf32>
    %cst_5 = arith.constant 0.000000e+00 : f32
    %6 = vector.broadcast %cst_5 : f32 to vector<8x32xf32>
    %7 = arith.maximumf %5, %6 : vector<8x32xf32>
    %8 = arith.truncf %7 : vector<8x32xf32> to vector<8x32xbf16>
    %c0_6 = arith.constant 0 : index
    %c0_7 = arith.constant 0 : index
    %9 = vector.load %arg4[%c0_6, %c0_7] : memref<32x4xbf16, #tpu.memory_space<vmem>>, vector<32x4xbf16>
    %cst_8 = arith.constant dense<0.000000e+00> : vector<8x4xf32>
    %10 = tpu.matmul %8, %9, %cst_8 {dimension_numbers = #tpu.dot_dimension_numbers<[1], [0], [0], [1], [0, 0, 1, 1], [], []>} : vector<8x32xbf16>, vector<32x4xbf16>, vector<8x4xf32> -> vector<8x4xf32>
    %c0_9 = arith.constant 0 : index
    %c0_10 = arith.constant 0 : index
    %11 = vector.load %arg5[%c0_9, %c0_10] : memref<1x4xf32, #tpu.memory_space<vmem>>, vector<1x4xf32>
    %12 = vector.broadcast %11 : vector<1x4xf32> to vector<8x4xf32>
    %13 = arith.addf %10, %12 : vector<8x4xf32>
    %14 = arith.negf %13 : vector<8x4xf32>
    %15 = math.exp %14 : vector<8x4xf32>
    %cst_11 = arith.constant 1.000000e+00 : f32
    %16 = vector.broadcast %cst_11 : f32 to vector<8x4xf32>
    %17 = arith.addf %16, %15 : vector<8x4xf32>
    %18 = arith.divf %16, %17 : vector<8x4xf32>
    %c0_12 = arith.constant 0 : index
    %c0_13 = arith.constant 0 : index
    %19 = vector.load %arg6[%c0_12, %c0_13] : memref<8x4xf32, #tpu.memory_space<vmem>>, vector<8x4xf32>
    tpu.vector_store %arg6[%c0_12, %c0_13], %18 {strides = array<i32>} : memref<8x4xf32, #tpu.memory_space<vmem>>, vector<8x4xf32>,
    return
  }
  func.func @transform_0(%arg0: i32) -> (i32, i32) {
    %c0_i32 = arith.constant 0 : i32
    %c0_i32_0 = arith.constant 0 : i32
    return %arg0, %c0_i32 : i32, i32
  }
  func.func @transform_1(%arg0: i32) -> (i32, i32) {
    %c0_i32 = arith.constant 0 : i32
    %c0_i32_0 = arith.constant 0 : i32
    %c0_i32_1 = arith.constant 0 : i32
    return %c0_i32, %c0_i32_0 : i32, i32
  }
  func.func @transform_2(%arg0: i32) -> (i32, i32) {
    %c0_i32 = arith.constant 0 : i32
    %c0_i32_0 = arith.constant 0 : i32
    %c0_i32_1 = arith.constant 0 : i32
    return %c0_i32, %c0_i32_0 : i32, i32
  }
  func.func @transform_3(%arg0: i32) -> (i32, i32) {
    %c0_i32 = arith.constant 0 : i32
    %c0_i32_0 = arith.constant 0 : i32
    %c0_i32_1 = arith.constant 0 : i32
    return %c0_i32, %c0_i32_0 : i32, i32
  }
  func.func @transform_4(%arg0: i32) -> (i32, i32) {
    %c0_i32 = arith.constant 0 : i32
    %c0_i32_0 = arith.constant 0 : i32
    %c0_i32_1 = arith.constant 0 : i32
    return %c0_i32, %c0_i32_0 : i32, i32
  }
  func.func @transform_5(%arg0: i32) -> (i32, i32) {
    %c0_i32 = arith.constant 0 : i32
    %c0_i32_0 = arith.constant 0 : i32
    return %arg0, %c0_i32 : i32, i32
  }
}

</mosaic_0001>

<bundles_post_ra>
// kernel: policy_forward.1
= control target key start
LH: loop header
LB: loop body
LE: loop exit
PB: predicated region body
PF: predicated region fallthrough
CT: control target
= control target key end

     0   :  { %v198_v0 = vmov 0.0   ;;  %vm199_vm0 = vmmov 0   ;;  %vm37_vm1 = vcmask 130048   ;;  %vm106_vm2 = vcmask 261120   ;;  %s251_s1 = inlined_call_operand.vmem [shape: bf16[16,32], index: 1, kind: input, shape index: {}]   ;;  %s252_s0 = inlined_call_operand.vmem [shape: bf16[8,16], index: 0, kind: input, shape index: {}]   ;;  %s253_s3 = inlined_call_operand.vmem [shape: bf16[32,4], index: 3, kind: input, shape index: {}]   ;;  %s254_s2 = inlined_call_operand.vmem [shape: f32[1,32], index: 2, kind: input, shape index: {}]   ;;  %s255_s4 = inlined_call_operand.vmem [shape: f32[1,4], index: 4, kind: input, shape index: {}]   ;;  %s256_s5 = inlined_call_operand.vmem [shape: f32[8,4], index: 5, kind: output, shape index: {}]  }
   0x1   :  { %175 = vmatprep.subr.bf16.mxu0 %v198_v0  ;;  %v191_v1 = vld [vmem:[%s251_s1] sm:$0xff]   ;;  %177 = vmatprep.mubr.msk.bf16.mxu0 %vm199_vm0, %v198_v0  ;;  %v192_v3 = vld [vmem:[%s253_s3 + $0x8] sm:$0xff]   ;;  %vm156_vm3 = vcmask 31744  }
   0x2   :  { %181 = vmatprep.subr.bf16.mxu1 %v198_v0  ;;  %185 = vmatprep.mubr.msk.bf16.mxu1 %vm199_vm0, %v198_v0  ;;  %v21_v2 = vld [vmem:[%s252_s0] sm:$0xf] }
   0x3   :  { %176 = vmatpush3.bf16.msra.mxu0 %v191_v1  ;;  %182 = vmatpush3.bf16.msra.mxu1 %v192_v3  ;;  %v193_v4 = vld [vmem:[%s253_s3] sm:$0xff]  }
   0x4   :  { %183 = vmatprep.subr.bf16.mxu1 %v198_v0  ;;  %v162_v5 = vld [vmem:[%s254_s2] ss:$0 sm:$0xff] }
   0x5   :  { %v165_v13 = vld [vmem:[%s255_s4] ss:$0 sm:$0xff] }
   0x6   :  { %178 = vmatmul.mubr.msk.bf16.vlgmr.msra.gmra.mxu0 %vm37_vm1, %v21_v2 }
   0x7   :  { %184 = vmatpush3.bf16.msra.mxu1 %v193_v4 }
  0xc6   :  { %v75_v6 = vpop.f32.mrf.mxu0 }
  0xc7   :  { %v76_v7 = vadd.f32 %v162_v5, %v75_v6 }
  0xc8   :  { %v179_v8 = vpop.f32.mrf.mxu0 }
  0xc9   :  { %v81_v9 = vmax.f32 %v76_v7, 0.0 }
  0xca   :  { %v78_v10 = vpop.f32.mrf.mxu0 }
  0xcb   :  { %v82_v11 = vpack.c.bf16 %v81_v9, %v81_v9 }
  0xcc   :  { %v180_v12 = vpop.f32.mrf.mxu0 }
  0xcd   :  { %186 = vmatmul.mubr.msk.bf16.vlgmr.msra.gmra.mxu1 %vm106_vm2, %v82_v11 }
 0x18d   :  { %v144_v14 = vpop.f32.mrf.mxu1 }
 0x18e   :  { %v145_v15 = vadd.f32 %v165_v13, %v144_v14 }
 0x18f   :  { %v187_v16 = vpop.f32.mrf.mxu1 }
 0x190   :  { %v169_v17 = vmul.f32 -1.442695, %v145_v15 }
 0x191   :  { %v147_v18 = vpop.f32.mrf.mxu1 }
 0x192   :  { %194 = vpow2.f32 %v169_v17 }
 0x193   :  { %v188_v19 = vpop.f32.mrf.mxu1 }
 0x19f   :  { %v195_v20 = vpop.eup %194 }
 0x1a0   :  { %v153_v21 = vadd.f32 1.0, %v195_v20 }
 0x1a2   :  { %196 = vrcp.f32 %v153_v21 }
 0x1af   :  { %v197_v22 = vpop.eup %196 }
 0x1b0   :  { %157 = vst.msk [vmem:[%s256_s5] sm:$0xff] %vm156_vm3, %v197_v22 }

</bundles_post_ra>
